<compile_context>
chip_gen: v6e
topology: v6e:2x2x1
jax: 0.10.0
libtpu: 0.0.40
codegen_flags: <defaults>
</compile_context>

<pallas_src>
import math

import numpy as np
import jax
import jax.numpy as jnp
from jax.experimental import pallas as pl
from jax.experimental.pallas import tpu as pltpu

EPS = 1e-7
_K10_LN10_SQ = (10.0 / math.log(10.0)) ** 2   # (10/ln10)^2, applied after the F-reduction


# ----------------------------- kernel -----------------------------------

def generator_loss_kernel(pr_ref, pi_ref, tr_ref, ti_ref, fq_ref, out_ref):
    """One (b, c) block -> raw partial sums in lanes 0..2 of out_ref (1,1,1,128)."""
    f32 = jnp.float32
    pr = pr_ref[...].astype(f32)          # (1, 1, F, T)
    pi = pi_ref[...].astype(f32)
    tr = tr_ref[...].astype(f32)
    ti = ti_ref[...].astype(f32)
    fq = fq_ref[...].astype(f32)          # (1, 1, F, 1) — broadcast in-kernel

    # --- per-sample L1 (fused real+imag raw sum; 1/N applied in wrapper) ---
    per_sum = jnp.sum(jnp.abs(pr - tr) + jnp.abs(pi - ti))

    # --- magnitudes (== torch.abs(complex)) ---
    mag_p = jnp.sqrt(pr * pr + pi * pi)
    mag_t = jnp.sqrt(tr * tr + ti * ti)

    # --- spectral centroid / spread via moments: one pass over F (axis 2) ---
    fq2 = fq * fq

    def centroid_spread(mag):
        s0 = jnp.sum(mag, axis=2, keepdims=True)          # (1,1,1,T)
        s1 = jnp.sum(fq * mag, axis=2, keepdims=True)
        s2 = jnp.sum(fq2 * mag, axis=2, keepdims=True)
        fm = s0 + EPS
        c = s1 / fm
        # sum((f - c)^2 * m) == s2 - 2*c*s1 + c^2*s0 ; clamp for cancellation near 0
        var_num = jnp.maximum(s2 - 2.0 * c * s1 + c * c * s0, 0.0)
        spread = jnp.sqrt(var_num / fm + EPS)
        return c, spread

    c_p, s_p = centroid_spread(mag_p)
    c_t, s_t = centroid_spread(mag_t)
    freq_sum = jnp.sum(jnp.abs(c_p - c_t) + jnp.abs(s_p - s_t))

    # --- spectral flux ---
    # 10*log10(x) = (10/ln10)*ln(x): keep only the ln per element; the
    # (10/ln10)^2 scale is applied after the F-reduction and 1/n_freq is
    # folded into the wrapper denominator (both exact).
    lp = jnp.log(mag_p + EPS)
    lt = jnp.log(mag_t + EPS)
    # Time-difference along the lane axis. T is kept whole per block, so the
    # slices stay inside this block (no halo needed); at real, lane-dense T
    # this could be swapped for pltpu.roll(-1) plus a wrapped-column mask.
    dp = lp[:, :, :, 1:] - lp[:, :, :, :-1]               # (1,1,F,T-1)
    dt = lt[:, :, :, 1:] - lt[:, :, :, :-1]
    fzp = _K10_LN10_SQ * jnp.sum(dp * dp, axis=2, keepdims=True)   # (1,1,1,T-1)
    fzt = _K10_LN10_SQ * jnp.sum(dt * dt, axis=2, keepdims=True)
    flux_sum = jnp.sum(jnp.abs(jnp.sqrt(fzp + EPS) - jnp.sqrt(fzt + EPS)))

    # --- pack the three raw partial sums into lanes 0..2 (lane-dense store) ---
    lane = jax.lax.broadcasted_iota(jnp.int32, out_ref.shape, dimension=3)
    out_ref[...] = jnp.where(lane == 0, per_sum,
                   jnp.where(lane == 1, freq_sum,
                   jnp.where(lane == 2, flux_sum, 0.0)))


# ----------------------------- wrapper -----------------------------------

def generator_loss(pred_real, pred_imag, tgt_real, tgt_imag, freqs,
                   *, alpha=0.5, beta=0.25):
    """freqs: the module's self.freqs parameter, shape (B_max, 1, F, 1).

    Mirrors GeneratorLoss.forward with complex inputs split into real/imag.
    Inputs may be f32 or bf16 (upcast happens inside the kernel).
    """
    B, C, Fdim, T = pred_real.shape
    freqs_b = freqs[:B].astype(jnp.float32)               # (B,1,F,1) — no full-size broadcast

    # Per-step footprint: 4 double-buffered input tiles + in-kernel intermediates.
    tile_bytes = Fdim * T * 4
    vmem_limit = int(min(48 * 1024 * 1024, max(32 * 1024 * 1024, 24 * tile_bytes)))

    partials = pl.pallas_call(
        generator_loss_kernel,
        out_shape=jax.ShapeDtypeStruct((B, C, 1, 128), jnp.float32),
        grid_spec=pltpu.PrefetchScalarGridSpec(
            num_scalar_prefetch=0,
            grid=(B, C),
            in_specs=[
                pl.BlockSpec((1, 1, Fdim, T), lambda b, c: (b, c, 0, 0)),
                pl.BlockSpec((1, 1, Fdim, T), lambda b, c: (b, c, 0, 0)),
                pl.BlockSpec((1, 1, Fdim, T), lambda b, c: (b, c, 0, 0)),
                pl.BlockSpec((1, 1, Fdim, T), lambda b, c: (b, c, 0, 0)),
                pl.BlockSpec((1, 1, Fdim, 1), lambda b, c: (b, 0, 0, 0)),   # freqs
            ],
            out_specs=pl.BlockSpec((1, 1, 1, 128), lambda b, c: (b, c, 0, 0)),
        ),
        compiler_params=pltpu.CompilerParams(
            dimension_semantics=("parallel", "parallel"),
            vmem_limit_bytes=vmem_limit),
    )(pred_real, pred_imag, tgt_real, tgt_imag, freqs_b)

    # Combine raw partial sums; apply 1/N, alpha, beta exactly once.
    sums = jnp.sum(partials[:, :, 0, :3], axis=(0, 1))    # (3,)
    per_loss = sums[0] / (B * C * Fdim * T)
    freq_loss = sums[1] / (B * C * T)
    time_loss = sums[2] / (Fdim * B * C * (T - 1))        # 1/n_freq folded in here
    return per_loss + alpha * freq_loss + beta * time_loss


# ----------------------------- reference ---------------------------------

def reference_loss(pred, tgt, freqs, alpha, beta, eps=EPS):
    """Pure-JAX transcription of the PyTorch module (for verification)."""
    per = jnp.mean(jnp.abs(pred.real - tgt.real)) + jnp.mean(jnp.abs(pred.imag - tgt.imag))

    def cs(mag):
        b = mag.shape[0]
        f = freqs[:b]
        fz = jnp.sum(f * mag, axis=2)
        fm = jnp.sum(mag, axis=2) + eps
        c = fz / fm
        fz2 = jnp.sum((f - c[:, :, None, :]) ** 2 * mag, axis=2)
        return c, jnp.sqrt(fz2 / fm + eps)

    def flux(mag):
        m = 10.0 * jnp.log10(mag + eps)
        d = m[:, :, :, 1:] - m[:, :, :, :-1]
        return jnp.sqrt(jnp.sum(d ** 2, axis=2) + eps) / mag.shape[2]

    mp, mt = jnp.abs(pred), jnp.abs(tgt)
    scp, ssp = cs(mp)
    sct, sst = cs(mt)
    freq_l = jnp.mean(jnp.abs(scp - sct)) + jnp.mean(jnp.abs(ssp - sst))
    time_l = jnp.mean(jnp.abs(flux(mp) - flux(mt)))
    return per + alpha * freq_l + beta * time_l


# ------------------------------- main ------------------------------------

if __name__ == "__main__":
    B, C, F, T = 2, 4, 16, 16
    alpha, beta = 0.5, 0.25

    key = jax.random.PRNGKey(0)
    k1, k2, k3, k4 = jax.random.split(key, 4)
    pred_real = jax.random.normal(k1, (B, C, F, T), dtype=jnp.float32)
    pred_imag = jax.random.normal(k2, (B, C, F, T), dtype=jnp.float32)
    tgt_real = jax.random.normal(k3, (B, C, F, T), dtype=jnp.float32)
    tgt_imag = jax.random.normal(k4, (B, C, F, T), dtype=jnp.float32)

    # deterministic "freqs" parameter (module __init__ argument): (B, 1, F, 1)
    freqs = jnp.broadcast_to(
        jnp.linspace(0.0, 1.0, F, dtype=jnp.float32).reshape(1, 1, F, 1),
        (B, 1, F, 1))

    loss = generator_loss(pred_real, pred_imag, tgt_real, tgt_imag, freqs,
                          alpha=alpha, beta=beta)
    loss = jax.block_until_ready(loss)

    # verify against a pure-JAX transcription of the PyTorch module
    pred_c = pred_real + 1j * pred_imag
    tgt_c = tgt_real + 1j * tgt_imag
    ref = jax.block_until_ready(reference_loss(pred_c, tgt_c, freqs, alpha, beta))
    np.testing.assert_allclose(np.asarray(loss), np.asarray(ref),
                               rtol=2e-3, atol=1e-4)

    print("KERNEL_OK")
</pallas_src>

<mosaic_0001>
module attributes {stable_mosaic.version = 11 : i64} {
  func.func @generator_loss_kernel(%arg0: i32, %arg1: i32, %arg2: memref<1x1x16x16xf32, #tpu.memory_space<vmem>>, %arg3: memref<1x1x16x16xf32, #tpu.memory_space<vmem>>, %arg4: memref<1x1x16x16xf32, #tpu.memory_space<vmem>>, %arg5: memref<1x1x16x16xf32, #tpu.memory_space<vmem>>, %arg6: memref<1x1x16x1xf32, #tpu.memory_space<vmem>>, %arg7: memref<1x1x1x128xf32, #tpu.memory_space<vmem>>) attributes {dimension_semantics = [#tpu.dimension_semantics<parallel>, #tpu.dimension_semantics<parallel>], iteration_bounds = array<i64: 2, 4>, scalar_prefetch = 0 : i64, scratch_operands = 0 : i64, tpu.core_type = #tpu.core_type<tc>, window_params = [{transform_indices = @transform_0, window_bounds = array<i64: 1, 1, 16, 16>}, {transform_indices = @transform_1, window_bounds = array<i64: 1, 1, 16, 16>}, {transform_indices = @transform_2, window_bounds = array<i64: 1, 1, 16, 16>}, {transform_indices = @transform_3, window_bounds = array<i64: 1, 1, 16, 16>}, {transform_indices = @transform_4, window_bounds = array<i64: 1, 1, 16, 1>}, {transform_indices = @transform_5, window_bounds = array<i64: 1, 1, 1, 128>}]} {
    %c0 = arith.constant 0 : index
    %c0_0 = arith.constant 0 : index
    %c0_1 = arith.constant 0 : index
    %c0_2 = arith.constant 0 : index
    %0 = vector.load %arg2[%c0, %c0_0, %c0_1, %c0_2] : memref<1x1x16x16xf32, #tpu.memory_space<vmem>>, vector<1x1x16x16xf32>
    %c0_3 = arith.constant 0 : index
    %c0_4 = arith.constant 0 : index
    %c0_5 = arith.constant 0 : index
    %c0_6 = arith.constant 0 : index
    %1 = vector.load %arg3[%c0_3, %c0_4, %c0_5, %c0_6] : memref<1x1x16x16xf32, #tpu.memory_space<vmem>>, vector<1x1x16x16xf32>
    %c0_7 = arith.constant 0 : index
    %c0_8 = arith.constant 0 : index
    %c0_9 = arith.constant 0 : index
    %c0_10 = arith.constant 0 : index
    %2 = vector.load %arg4[%c0_7, %c0_8, %c0_9, %c0_10] : memref<1x1x16x16xf32, #tpu.memory_space<vmem>>, vector<1x1x16x16xf32>
    %c0_11 = arith.constant 0 : index
    %c0_12 = arith.constant 0 : index
    %c0_13 = arith.constant 0 : index
    %c0_14 = arith.constant 0 : index
    %3 = vector.load %arg5[%c0_11, %c0_12, %c0_13, %c0_14] : memref<1x1x16x16xf32, #tpu.memory_space<vmem>>, vector<1x1x16x16xf32>
    %c0_15 = arith.constant 0 : index
    %c0_16 = arith.constant 0 : index
    %c0_17 = arith.constant 0 : index
    %c0_18 = arith.constant 0 : index
    %4 = vector.load %arg6[%c0_15, %c0_16, %c0_17, %c0_18] : memref<1x1x16x1xf32, #tpu.memory_space<vmem>>, vector<1x1x16x1xf32>
    %5 = arith.subf %0, %2 : vector<1x1x16x16xf32>
    %6 = math.absf %5 : vector<1x1x16x16xf32>
    %7 = arith.subf %1, %3 : vector<1x1x16x16xf32>
    %8 = math.absf %7 : vector<1x1x16x16xf32>
    %9 = arith.addf %6, %8 : vector<1x1x16x16xf32>
    %10 = vector.shape_cast %9 : vector<1x1x16x16xf32> to vector<1x1x1x16x16xf32>
    %cst = arith.constant dense<0.000000e+00> : vector<1xf32>
    %11 = vector.multi_reduction <add>, %10, %cst [1, 2, 3, 4] : vector<1x1x1x16x16xf32> to vector<1xf32>
    %12 = vector.shape_cast %11 : vector<1xf32> to vector<1x1x1x1x1xf32>
    %13 = vector.extract %12[0, 0, 0, 0, 0] : f32 from vector<1x1x1x1x1xf32>
    %14 = arith.mulf %0, %0 : vector<1x1x16x16xf32>
    %15 = arith.mulf %1, %1 : vector<1x1x16x16xf32>
    %16 = arith.addf %14, %15 : vector<1x1x16x16xf32>
    %17 = math.sqrt %16 : vector<1x1x16x16xf32>
    %18 = arith.mulf %2, %2 : vector<1x1x16x16xf32>
    %19 = arith.mulf %3, %3 : vector<1x1x16x16xf32>
    %20 = arith.addf %18, %19 : vector<1x1x16x16xf32>
    %21 = math.sqrt %20 : vector<1x1x16x16xf32>
    %22 = arith.mulf %4, %4 : vector<1x1x16x1xf32>
    %cst_19 = arith.constant dense<0.000000e+00> : vector<1x1x16xf32>
    %23 = vector.multi_reduction <add>, %17, %cst_19 [2] : vector<1x1x16x16xf32> to vector<1x1x16xf32>
    %24 = vector.shape_cast %23 : vector<1x1x16xf32> to vector<1x1x1x16xf32>
    %25 = vector.broadcast %4 : vector<1x1x16x1xf32> to vector<1x1x16x16xf32>
    %26 = arith.mulf %25, %17 : vector<1x1x16x16xf32>
    %cst_20 = arith.constant dense<0.000000e+00> : vector<1x1x16xf32>
    %27 = vector.multi_reduction <add>, %26, %cst_20 [2] : vector<1x1x16x16xf32> to vector<1x1x16xf32>
    %28 = vector.shape_cast %27 : vector<1x1x16xf32> to vector<1x1x1x16xf32>
    %29 = vector.broadcast %22 : vector<1x1x16x1xf32> to vector<1x1x16x16xf32>
    %30 = arith.mulf %29, %17 : vector<1x1x16x16xf32>
    %cst_21 = arith.constant dense<0.000000e+00> : vector<1x1x16xf32>
    %31 = vector.multi_reduction <add>, %30, %cst_21 [2] : vector<1x1x16x16xf32> to vector<1x1x16xf32>
    %32 = vector.shape_cast %31 : vector<1x1x16xf32> to vector<1x1x1x16xf32>
    %cst_22 = arith.constant 1.000000e-07 : f32
    %33 = vector.broadcast %cst_22 : f32 to vector<1x1x1x16xf32>
    %34 = arith.addf %24, %33 : vector<1x1x1x16xf32>
    %35 = arith.divf %28, %34 : vector<1x1x1x16xf32>
    %cst_23 = arith.constant 2.000000e+00 : f32
    %36 = vector.broadcast %cst_23 : f32 to vector<1x1x1x16xf32>
    %37 = arith.mulf %36, %35 : vector<1x1x1x16xf32>
    %38 = arith.mulf %37, %28 : vector<1x1x1x16xf32>
    %39 = arith.subf %32, %38 : vector<1x1x1x16xf32>
    %40 = arith.mulf %35, %35 : vector<1x1x1x16xf32>
    %41 = arith.mulf %40, %24 : vector<1x1x1x16xf32>
    %42 = arith.addf %39, %41 : vector<1x1x1x16xf32>
    %cst_24 = arith.constant 0.000000e+00 : f32
    %43 = vector.broadcast %cst_24 : f32 to vector<1x1x1x16xf32>
    %44 = arith.maximumf %42, %43 : vector<1x1x1x16xf32>
    %45 = arith.divf %44, %34 : vector<1x1x1x16xf32>
    %cst_25 = arith.constant 1.000000e-07 : f32
    %46 = vector.broadcast %cst_25 : f32 to vector<1x1x1x16xf32>
    %47 = arith.addf %45, %46 : vector<1x1x1x16xf32>
    %48 = math.sqrt %47 : vector<1x1x1x16xf32>
    %cst_26 = arith.constant dense<0.000000e+00> : vector<1x1x16xf32>
    %49 = vector.multi_reduction <add>, %21, %cst_26 [2] : vector<1x1x16x16xf32> to vector<1x1x16xf32>
    %50 = vector.shape_cast %49 : vector<1x1x16xf32> to vector<1x1x1x16xf32>
    %51 = vector.broadcast %4 : vector<1x1x16x1xf32> to vector<1x1x16x16xf32>
    %52 = arith.mulf %51, %21 : vector<1x1x16x16xf32>
    %cst_27 = arith.constant dense<0.000000e+00> : vector<1x1x16xf32>
    %53 = vector.multi_reduction <add>, %52, %cst_27 [2] : vector<1x1x16x16xf32> to vector<1x1x16xf32>
    %54 = vector.shape_cast %53 : vector<1x1x16xf32> to vector<1x1x1x16xf32>
    %55 = vector.broadcast %22 : vector<1x1x16x1xf32> to vector<1x1x16x16xf32>
    %56 = arith.mulf %55, %21 : vector<1x1x16x16xf32>
    %cst_28 = arith.constant dense<0.000000e+00> : vector<1x1x16xf32>
    %57 = vector.multi_reduction <add>, %56, %cst_28 [2] : vector<1x1x16x16xf32> to vector<1x1x16xf32>
    %58 = vector.shape_cast %57 : vector<1x1x16xf32> to vector<1x1x1x16xf32>
    %cst_29 = arith.constant 1.000000e-07 : f32
    %59 = vector.broadcast %cst_29 : f32 to vector<1x1x1x16xf32>
    %60 = arith.addf %50, %59 : vector<1x1x1x16xf32>
    %61 = arith.divf %54, %60 : vector<1x1x1x16xf32>
    %cst_30 = arith.constant 2.000000e+00 : f32
    %62 = vector.broadcast %cst_30 : f32 to vector<1x1x1x16xf32>
    %63 = arith.mulf %62, %61 : vector<1x1x1x16xf32>
    %64 = arith.mulf %63, %54 : vector<1x1x1x16xf32>
    %65 = arith.subf %58, %64 : vector<1x1x1x16xf32>
    %66 = arith.mulf %61, %61 : vector<1x1x1x16xf32>
    %67 = arith.mulf %66, %50 : vector<1x1x1x16xf32>
    %68 = arith.addf %65, %67 : vector<1x1x1x16xf32>
    %cst_31 = arith.constant 0.000000e+00 : f32
    %69 = vector.broadcast %cst_31 : f32 to vector<1x1x1x16xf32>
    %70 = arith.maximumf %68, %69 : vector<1x1x1x16xf32>
    %71 = arith.divf %70, %60 : vector<1x1x1x16xf32>
    %cst_32 = arith.constant 1.000000e-07 : f32
    %72 = vector.broadcast %cst_32 : f32 to vector<1x1x1x16xf32>
    %73 = arith.addf %71, %72 : vector<1x1x1x16xf32>
    %74 = math.sqrt %73 : vector<1x1x1x16xf32>
    %75 = arith.subf %35, %61 : vector<1x1x1x16xf32>
    %76 = math.absf %75 : vector<1x1x1x16xf32>
    %77 = arith.subf %48, %74 : vector<1x1x1x16xf32>
    %78 = math.absf %77 : vector<1x1x1x16xf32>
    %79 = arith.addf %76, %78 : vector<1x1x1x16xf32>
    %80 = vector.shape_cast %79 : vector<1x1x1x16xf32> to vector<1x1x1x1x16xf32>
    %cst_33 = arith.constant dense<0.000000e+00> : vector<1xf32>
    %81 = vector.multi_reduction <add>, %80, %cst_33 [1, 2, 3, 4] : vector<1x1x1x1x16xf32> to vector<1xf32>
    %82 = vector.shape_cast %81 : vector<1xf32> to vector<1x1x1x1x1xf32>
    %83 = vector.extract %82[0, 0, 0, 0, 0] : f32 from vector<1x1x1x1x1xf32>
    %cst_34 = arith.constant 1.000000e-07 : f32
    %84 = vector.broadcast %cst_34 : f32 to vector<1x1x16x16xf32>
    %85 = arith.addf %17, %84 : vector<1x1x16x16xf32>
    %86 = math.log %85 : vector<1x1x16x16xf32>
    %cst_35 = arith.constant 1.000000e-07 : f32
    %87 = vector.broadcast %cst_35 : f32 to vector<1x1x16x16xf32>
    %88 = arith.addf %21, %87 : vector<1x1x16x16xf32>
    %89 = math.log %88 : vector<1x1x16x16xf32>
    %90 = vector.extract_strided_slice %86 {offsets = [0, 0, 0, 1], sizes = [1, 1, 16, 15], strides = [1, 1, 1, 1]} : vector<1x1x16x16xf32> to vector<1x1x16x15xf32>
    %91 = vector.extract_strided_slice %86 {offsets = [0, 0, 0, 0], sizes = [1, 1, 16, 15], strides = [1, 1, 1, 1]} : vector<1x1x16x16xf32> to vector<1x1x16x15xf32>
    %92 = arith.subf %90, %91 : vector<1x1x16x15xf32>
    %93 = vector.extract_strided_slice %89 {offsets = [0, 0, 0, 1], sizes = [1, 1, 16, 15], strides = [1, 1, 1, 1]} : vector<1x1x16x16xf32> to vector<1x1x16x15xf32>
    %94 = vector.extract_strided_slice %89 {offsets = [0, 0, 0, 0], sizes = [1, 1, 16, 15], strides = [1, 1, 1, 1]} : vector<1x1x16x16xf32> to vector<1x1x16x15xf32>
    %95 = arith.subf %93, %94 : vector<1x1x16x15xf32>
    %96 = arith.mulf %92, %92 : vector<1x1x16x15xf32>
    %cst_36 = arith.constant dense<0.000000e+00> : vector<1x1x15xf32>
    %97 = vector.multi_reduction <add>, %96, %cst_36 [2] : vector<1x1x16x15xf32> to vector<1x1x15xf32>
    %98 = vector.shape_cast %97 : vector<1x1x15xf32> to vector<1x1x1x15xf32>
    %cst_37 = arith.constant 18.8611698 : f32
    %99 = vector.broadcast %cst_37 : f32 to vector<1x1x1x15xf32>
    %100 = arith.mulf %99, %98 : vector<1x1x1x15xf32>
    %101 = arith.mulf %95, %95 : vector<1x1x16x15xf32>
    %cst_38 = arith.constant dense<0.000000e+00> : vector<1x1x15xf32>
    %102 = vector.multi_reduction <add>, %101, %cst_38 [2] : vector<1x1x16x15xf32> to vector<1x1x15xf32>
    %103 = vector.shape_cast %102 : vector<1x1x15xf32> to vector<1x1x1x15xf32>
    %cst_39 = arith.constant 18.8611698 : f32
    %104 = vector.broadcast %cst_39 : f32 to vector<1x1x1x15xf32>
    %105 = arith.mulf %104, %103 : vector<1x1x1x15xf32>
    %cst_40 = arith.constant 1.000000e-07 : f32
    %106 = vector.broadcast %cst_40 : f32 to vector<1x1x1x15xf32>
    %107 = arith.addf %100, %106 : vector<1x1x1x15xf32>
    %108 = math.sqrt %107 : vector<1x1x1x15xf32>
    %cst_41 = arith.constant 1.000000e-07 : f32
    %109 = vector.broadcast %cst_41 : f32 to vector<1x1x1x15xf32>
    %110 = arith.addf %105, %109 : vector<1x1x1x15xf32>
    %111 = math.sqrt %110 : vector<1x1x1x15xf32>
    %112 = arith.subf %108, %111 : vector<1x1x1x15xf32>
    %113 = math.absf %112 : vector<1x1x1x15xf32>
    %114 = vector.shape_cast %113 : vector<1x1x1x15xf32> to vector<1x1x1x1x15xf32>
    %cst_42 = arith.constant dense<0.000000e+00> : vector<1xf32>
    %115 = vector.multi_reduction <add>, %114, %cst_42 [1, 2, 3, 4] : vector<1x1x1x1x15xf32> to vector<1xf32>
    %116 = vector.shape_cast %115 : vector<1xf32> to vector<1x1x1x1x1xf32>
    %117 = vector.extract %116[0, 0, 0, 0, 0] : f32 from vector<1x1x1x1x1xf32>
    %118 = tpu.iota {dimensions = array<i32: 3>} : vector<1x1x1x128xi32>
    %c0_i32 = arith.constant 0 : i32
    %119 = vector.broadcast %c0_i32 : i32 to vector<1x1x1x128xi32>
    %120 = arith.cmpi eq, %118, %119 : vector<1x1x1x128xi32>
    %c1_i32 = arith.constant 1 : i32
    %121 = vector.broadcast %c1_i32 : i32 to vector<1x1x1x128xi32>
    %122 = arith.cmpi eq, %118, %121 : vector<1x1x1x128xi32>
    %c2_i32 = arith.constant 2 : i32
    %123 = vector.broadcast %c2_i32 : i32 to vector<1x1x1x128xi32>
    %124 = arith.cmpi eq, %118, %123 : vector<1x1x1x128xi32>
    %cst_43 = arith.constant 0.000000e+00 : f32
    %125 = vector.broadcast %117 : f32 to vector<1x1x1x128xf32>
    %126 = vector.broadcast %cst_43 : f32 to vector<1x1x1x128xf32>
    %127 = arith.select %124, %125, %126 : vector<1x1x1x128xi1>, vector<1x1x1x128xf32>
    %128 = vector.broadcast %83 : f32 to vector<1x1x1x128xf32>
    %129 = arith.select %122, %128, %127 : vector<1x1x1x128xi1>, vector<1x1x1x128xf32>
    %130 = vector.broadcast %13 : f32 to vector<1x1x1x128xf32>
    %131 = arith.select %120, %130, %129 : vector<1x1x1x128xi1>, vector<1x1x1x128xf32>
    %c0_44 = arith.constant 0 : index
    %c0_45 = arith.constant 0 : index
    %c0_46 = arith.constant 0 : index
    %c0_47 = arith.constant 0 : index
    %132 = vector.load %arg7[%c0_44, %c0_45, %c0_46, %c0_47] : memref<1x1x1x128xf32, #tpu.memory_space<vmem>>, vector<1x1x1x128xf32>
    tpu.vector_store %arg7[%c0_44, %c0_45, %c0_46, %c0_47], %131 {strides = array<i32>} : memref<1x1x1x128xf32, #tpu.memory_space<vmem>>, vector<1x1x1x128xf32>,
    return
  }
  func.func @transform_0(%arg0: i32, %arg1: i32) -> (i32, i32, i32, i32) {
    %c0_i32 = arith.constant 0 : i32
    %c0_i32_0 = arith.constant 0 : i32
    %c0_i32_1 = arith.constant 0 : i32
    return %arg0, %arg1, %c0_i32, %c0_i32_0 : i32, i32, i32, i32
  }
  func.func @transform_1(%arg0: i32, %arg1: i32) -> (i32, i32, i32, i32) {
    %c0_i32 = arith.constant 0 : i32
    %c0_i32_0 = arith.constant 0 : i32
    %c0_i32_1 = arith.constant 0 : i32
    return %arg0, %arg1, %c0_i32, %c0_i32_0 : i32, i32, i32, i32
  }
  func.func @transform_2(%arg0: i32, %arg1: i32) -> (i32, i32, i32, i32) {
    %c0_i32 = arith.constant 0 : i32
    %c0_i32_0 = arith.constant 0 : i32
    %c0_i32_1 = arith.constant 0 : i32
    return %arg0, %arg1, %c0_i32, %c0_i32_0 : i32, i32, i32, i32
  }
  func.func @transform_3(%arg0: i32, %arg1: i32) -> (i32, i32, i32, i32) {
    %c0_i32 = arith.constant 0 : i32
    %c0_i32_0 = arith.constant 0 : i32
    %c0_i32_1 = arith.constant 0 : i32
    return %arg0, %arg1, %c0_i32, %c0_i32_0 : i32, i32, i32, i32
  }
  func.func @transform_4(%arg0: i32, %arg1: i32) -> (i32, i32, i32, i32) {
    %c0_i32 = arith.constant 0 : i32
    %c0_i32_0 = arith.constant 0 : i32
    %c0_i32_1 = arith.constant 0 : i32
    %c0_i32_2 = arith.constant 0 : i32
    return %arg0, %c0_i32, %c0_i32_0, %c0_i32_1 : i32, i32, i32, i32
  }
  func.func @transform_5(%arg0: i32, %arg1: i32) -> (i32, i32, i32, i32) {
    %c0_i32 = arith.constant 0 : i32
    %c0_i32_0 = arith.constant 0 : i32
    %c0_i32_1 = arith.constant 0 : i32
    return %arg0, %arg1, %c0_i32, %c0_i32_0 : i32, i32, i32, i32
  }
}

</mosaic_0001>

<bundles_post_ra>
// kernel: tpu_custom_call.1
= control target key start
LH: loop header
LB: loop body
LE: loop exit
PB: predicated region body
PF: predicated region fallthrough
CT: control target
= control target key end

     0   :  { %s1669_s0 = inlined_call_operand.hbm [shape: f32[2,4,16,16], index: 0, kind: input, shape index: {}]   ;;  %s1670_s1 = inlined_call_operand.hbm [shape: f32[2,4,16,16], index: 1, kind: input, shape index: {}]   ;;  %s1671_s2 = inlined_call_operand.hbm [shape: f32[2,4,16,16], index: 2, kind: input, shape index: {}]   ;;  %s1672_s3 = inlined_call_operand.hbm [shape: f32[2,4,16,16], index: 3, kind: input, shape index: {}]   ;;  %s1673_s4 = inlined_call_operand.vmem [shape: f32[2,1,16,1], index: 4, kind: input, shape index: {}]   ;;  %s1674_s5 = inlined_call_operand.hbm [shape: f32[2,4,1,128], index: 5, kind: output, shape index: {}]  }
   0x1   :  { %1684 = sst [smem:[#allocation23_spill]] %s1669_s0 }
   0x2   :  { %1685 = sst [smem:[#allocation24_spill]] %s1670_s1 }
   0x3   :  { %10 = vsyncpa [#allocation3], 0 }
   0x4   :  { %12 = vsyncpa [#allocation3 + $0x1], 0 }
   0x5   :  { %13 = vsyncpa [#allocation6], 0 }
   0x6   :  { %15 = vsyncpa [#allocation6 + $0x1], 0 }
   0x7   :  { %16 = vsyncpa [#allocation9], 0 }
   0x8   :  { %18 = vsyncpa [#allocation9 + $0x1], 0 }
   0x9   :  { %19 = vsyncpa [#allocation4], 0 }
   0xa   :  { %21 = vsyncpa [#allocation4 + $0x1], 0  ;;  %s1330_s18 = smov 0   ;;  %s1332_s19 = smov 0  }
   0xb   :  { %s1334_s20 = smov 0   ;;  %s1336_s21 = smov 0  }
   0xc   :  { %s1338_s22 = smov 0   ;;  %s1340_s23 = smov 0  }
   0xd   :  { %s1342_s24 = smov 0   ;;  %s1344_s25 = smov 0  }
   0xe LB: > { %1686 = sst [smem:[#allocation15_spill]] %s1260_s18  ;;  %s1371_s26 = sadd.s32 4294967295, %s1288_s25   ;;  %s1288_s25 = sphi %s1344_s25, %s27_s25   ;;  %s1284_s24 = sphi %s1342_s24, %s1710_s24   ;;  %s1280_s23 = sphi %s1340_s23, %s1713_s23   ;;  %s1276_s22 = sphi %s1338_s22, %s1708_s22   ;;  %s1272_s21 = sphi %s1336_s21, %s1707_s21   ;;  %s1268_s20 = sphi %s1334_s20, %s1706_s20   ;;  %s1264_s19 = sphi %s1332_s19, %s1712_s19   ;;  %s1260_s18 = sphi %s1330_s18, %s1711_s18  }
   0xf   : > { %1687 = sst [smem:[#allocation16_spill]] %s1268_s20  ;;  %s907_s27 = sadd.s32 4294967294, %s1288_s25  }
  0x10   : > { %1688 = sst [smem:[#allocation17_spill]] %s1280_s23  ;;  %s36_s28 = sadd.s32 1, %s1280_s23 }
  0x11   : > { %1689 = sst [smem:[#allocation18_spill]] %s1284_s24  ;;  %s39_s29 = sadd.s32 1, %s1284_s24 }
  0x12   : > { %p37_p0 = scmp.ge.s32.totalorder %s36_s28, 4  ;;  %s48_s30 = sadd.s32 1, %s1268_s20 }
  0x13   : > { %p55_p1 = scmp.ne.s32.totalorder %s1268_s20, %s1264_s19  ;;  %p56_p2 = scmp.eq.s32.totalorder %s1288_s25, 0 }
  0x14   : > { %s1715_s28 = smov (%p37_p0, %s36_s28), 0  ;;  %s1717_s29 = smov (!%p37_p0, %s39_s29), %s1284_s24 }
  0x15   : > { %1690 = sst [smem:[#allocation19_spill]] %s1715_s28  ;;  %s44_s6 = ssub.s32 %s1280_s23, %s1715_s28 }
  0x16   : > { %p1385_p3 = por %p56_p2, %p55_p1  ;;  %p41_p4 = scmp.ge.s32.totalorder %s1717_s29, 2 }
  0x17   : > { %p61_p5 = scmp.ne.s32.totalorder %s1264_s19, %s1260_s18  ;;  %p62_p6 = scmp.eq.s32.totalorder %s1371_s26, 0 }
  0x18   : > { %p197_p7 = scmp.eq.s32.totalorder %s1371_s26, 7  ;;  %s1719_s29 = smov (%p41_p4, %s1717_s29), 0 }
  0x19   : > { %1692 = sst [smem:[#allocation20_spill]] %s1719_s29  ;;  %p1395_p8 = por %p62_p6, %p61_p5 }
  0x1a   : > { %p1399_p9 = por %p197_p7, %p55_p1  ;;  %s43_s10 = ssub.s32 %s1284_s24, %s1719_s29 }
  0x1b   : > { %p203_p10 = scmp.eq.s32.totalorder %s907_s27, 7  ;;  %s45_s11 = sor.u32 %s44_s6, %s43_s10 }
  0x1c   : > { %p46_p11 = scmp.eq.s32.totalorder %s45_s11, 0  ;;  %p971_p13 = scmp.lt.s32.totalorder %s1288_s25, 8 }
  0x1d   : > { %p1405_p12 = por %p203_p10, %p61_p5  ;;  %s1411_s13 = sand.u32 1, %s1268_s20  }
  0x1e   : > { %s1414_s14 = scalar_select %p46_p11, %s1268_s20, %s48_s30  }
  0x1f   : > { %s1695_s12 = scalar_select %p1405_p12, 1, 0 }
  0x20   : > { %1697 = sst [smem:[#allocation22_spill]] %s1414_s14  ;;  %s1417_s15 = sshll.u32 %s1411_s13, 4 }
  0x21   : > { %1696 = sst [smem:[#allocation21_spill]] %s1695_s12  ;;  %s911_s16 = sshll.u32 %s1280_s23, 1 }
  0x22   : > { %s912_s17 = sshll.u32 %s1284_s24, 3  ;;  %p1423_p0 = pnand %p971_p13, %p1385_p3 }
  0x23   : > { %s233_s6 = sadd.s32 %s912_s17, %s911_s16  ;;  %s246_s11 = sand.u32 1, %s1288_s25  }
  0x24   : > { %s1427_s10 = sshll.u32 %s233_s6, 7  ;;  %s1699_s1 = sld [smem:[#allocation24_spill]] }
  0x25   : > { %s250_s14 = scalar_lea.vmem [#allocation5], %s1417_s15  ;;  %p926_p1 = scmp.ge.s32.totalorder %s1288_s25, 1 }
  0x26   : > { %s259_s20 = sshll.u32 %s250_s14, 4  ;;  %s1436_s7 = scalar_lea.sflag [#allocation6], %s246_s11  ;;  %s260_s20 = int_to_ptr.vmem [resolvable:$true] %s259_s20 }
  0x27   : > { %p1074_p2 = pneg %p1423_p0  ;;  %s1085_s24 = scalar_lea.vmem %s260_s20, 256 }
  0x28   : > { %p1086_p3 = scmp.ne.s32.totalorder %s260_s20, %s1085_s24  ;;  %s1290_s16 = smov [#allocation5]  }
  0x29   : > { %s1090_s17 = sshll.u32 %s1290_s16, 4  ;;  %s1091_s17 = int_to_ptr.vmem [resolvable:$false] %s1090_s17 }
  0x2a   : > { %s258_s28 = scalar_lea.hbm %s1699_s1, %s1427_s10  ;;  %p1088_p4 = pnand %p1086_p3, %p1074_p2 }
  0x2b   : > { %s1092_s6 = scalar_lea.vmem %s1091_s17, 512  ;;  %p1093_p6 = scmp.lt.s32.totalorder %s260_s20, %s1091_s17 }
  0x2c   : > { %p1089_p5 = pneg %p1088_p4  ;;  %p1094_p7 = scmp.lt.s32.totalorder %s1092_s6, %s1085_s24 }
  0x2e   : > { %p1095_p10 = por %p1094_p7, %p1093_p6 }
  0x30   : > { %p1096_p11 = pnand %p1095_p10, %p1089_p5 }
  0x32   : > { %1099 = shalt.err (!%p1096_p11)
}
  0x33   : > { %s1680_s29 = smov 128   ;;  %s1292_s14 = smov 8  }
  0x34   : > { %960 = dma.hbm_to_vmem [thread:$0]  (!%p1423_p0), %s258_s28, 256, %s260_s20, %s1436_s7, %s1680_s29, %s1680_s29, %s1292_s14  }
  0x35   : > { %p321_p13 = scmp.lt.s32.totalorder %s1288_s25, 9  ;;  %s1701_s0 = sld [smem:[#allocation23_spill]] }
  0x36   : > { %s227_s17 = scalar_lea.vmem [#allocation2], %s1417_s15  ;;  %s224_s1 = scalar_lea.sflag [#allocation3], %s1411_s13 }
  0x37   : > { %p1452_p3 = pnand %p926_p1, %p321_p13  ;;  %s236_s6 = sshll.u32 %s227_s17, 4  ;;  %s237_s6 = int_to_ptr.vmem [resolvable:$true] %s236_s6 }
  0x38   : > { %s1113_s23 = scalar_lea.vmem %s237_s6, 256  ;;  %s1293_s20 = smov [#allocation2]  }
  0x39   : > { %p1114_p4 = scmp.ne.s32.totalorder %s237_s6, %s1113_s23  ;;  %s1118_s28 = sshll.u32 %s1293_s20, 4  ;;  %s1119_s28 = int_to_ptr.vmem [resolvable:$false] %s1118_s28 }
  0x3a   : > { %s1120_s29 = scalar_lea.vmem %s1119_s28, 512  ;;  %p1121_p1 = scmp.lt.s32.totalorder %s237_s6, %s1119_s28 }
  0x3b   : > { %s235_s16 = scalar_lea.hbm %s1701_s0, %s1427_s10  ;;  %p1116_p5 = pnand %p1114_p4, %p1074_p2 }
  0x3c   : > { %p1122_p7 = scmp.lt.s32.totalorder %s1120_s29, %s1113_s23 }
  0x3d   : > { %p1117_p6 = pneg %p1116_p5 }
  0x3e   : > { %p1123_p10 = por %p1122_p7, %p1121_p1 }
  0x40   : > { %p1124_p11 = pnand %p1123_p10, %p1117_p6 }
  0x42   : > { %1127 = shalt.err (!%p1124_p11)
}
  0x43   : > { %s1702_s11 = smov 128   ;;  %s281_s20 = scalar_lea.hbm %s1671_s2, %s1427_s10 }
  0x44   : > { %957 = dma.hbm_to_vmem [thread:$0]  (!%p1423_p0), %s235_s16, 256, %s237_s6, %s224_s1, %s1702_s11, %s1702_s11, %s1292_s14  }
  0x45   : > { %s273_s0 = scalar_lea.vmem [#allocation7], %s1417_s15  ;;  %s1294_s29 = smov [#allocation7]  }
  0x46   : > { %s282_s12 = sshll.u32 %s273_s0, 4  ;;  %s1146_s28 = sshll.u32 %s1294_s29, 4  ;;  %s283_s12 = int_to_ptr.vmem [resolvable:$true] %s282_s12  ;;  %s1147_s28 = int_to_ptr.vmem [resolvable:$false] %s1146_s28 }
  0x47   : > { %s1141_s23 = scalar_lea.vmem %s283_s12, 256  ;;  %s1148_s18 = scalar_lea.vmem %s1147_s28, 512 }
  0x48   : > { %p1142_p13 = scmp.ne.s32.totalorder %s283_s12, %s1141_s23  ;;  %p1149_p6 = scmp.lt.s32.totalorder %s283_s12, %s1147_s28 }
  0x49   : > { %p1150_p1 = scmp.lt.s32.totalorder %s1148_s18, %s1141_s23 }
  0x4a   : > { %p1144_p4 = pnand %p1142_p13, %p1074_p2 }
  0x4b   : > { %p1151_p7 = por %p1150_p1, %p1149_p6 }
  0x4c   : > { %p1145_p5 = pneg %p1144_p4 }
  0x4e   : > { %p1152_p10 = pnand %p1151_p7, %p1145_p5 }
  0x50   : > { %1155 = shalt.err (!%p1152_p10)
}
  0x51   : > { %963 = dma.hbm_to_vmem [thread:$0]  (!%p1423_p0), %s281_s20, 256, %s283_s12, %s1436_s7, %s1702_s11, %s1702_s11, %s1292_s14  }
  0x52   : > { %s304_s16 = scalar_lea.hbm %s1672_s3, %s1427_s10  ;;  %s296_s6 = scalar_lea.vmem [#allocation8], %s1417_s15 }
  0x53   : > { %s305_s18 = sshll.u32 %s296_s6, 4  ;;  %s293_s30 = scalar_lea.sflag [#allocation9], %s1411_s13  ;;  %s306_s18 = int_to_ptr.vmem [resolvable:$true] %s305_s18 }
  0x54   : > { %s1169_s17 = scalar_lea.vmem %s306_s18, 256  ;;  %s1295_s23 = smov [#allocation8]  }
  0x55   : > { %p1170_p11 = scmp.ne.s32.totalorder %s306_s18, %s1169_s17  ;;  %s1174_s29 = sshll.u32 %s1295_s23, 4  ;;  %s1175_s29 = int_to_ptr.vmem [resolvable:$false] %s1174_s29 }
  0x56   : > { %s1176_s28 = scalar_lea.vmem %s1175_s29, 512  ;;  %p1177_p5 = scmp.lt.s32.totalorder %s306_s18, %s1175_s29 }
  0x57   : > { %p1172_p13 = pnand %p1170_p11, %p1074_p2  ;;  %p1178_p6 = scmp.lt.s32.totalorder %s1176_s28, %s1169_s17 }
  0x59   : > { %p1173_p4 = pneg %p1172_p13  ;;  %p1179_p1 = por %p1178_p6, %p1177_p5 }
  0x5b   : > { %p1180_p7 = pnand %p1179_p1, %p1173_p4 }
  0x5d   : > { %1183 = shalt.err (!%p1180_p7)
}
  0x5e   : > { %966 = dma.hbm_to_vmem [thread:$0]  (!%p1423_p0), %s304_s16, 256, %s306_s18, %s293_s30, %s1702_s11, %s1702_s11, %s1292_s14  }
  0x5f   : > { %325 = sbr.rel (%p1452_p3) target bundleno = 648 (0x288), region = 40  ;;  %s1501_s12 = sand.u32 (!%p1452_p3), 1, %s1264_s19  }
  0x60   : > { %s1504_s13 = sshll.u32 (!%p1452_p3), %s1501_s12, 4  ;;  %s328_s15 = scalar_lea.sflag (!%p1452_p3), [#allocation3], %s1501_s12 }
  0x61   : > { %s331_s10 = scalar_lea.vmem (!%p1452_p3), [#allocation2], %s1504_s13 }
  0x64   : > { %1243 = dma.done.wait (%p1395_p8), %s328_s15, 256  }
  0x65   : > { %1245 = vsyncadd (%p1395_p8), %s328_s15, 4294967040  ;;  %s336_s27 = sand.u32 1, %s1371_s26   ;;  %s340_s14 = scalar_lea.vmem [#allocation5], %s1504_s13 }
  0x66   : > { %s337_s7 = scalar_lea.sflag [#allocation6], %s336_s27 }
  0x67   : > { %1247 = dma.done.wait (%p1395_p8), %s337_s7, 512  }
  0x68   : > { %1249 = vsyncadd (%p1395_p8), %s337_s7, 4294966784  ;;  %s349_s24 = scalar_lea.vmem [#allocation7], %s1504_s13  ;;  %s355_s11 = scalar_lea.sflag [#allocation9], %s1501_s12 }
  0x69   : > { %s358_s20 = scalar_lea.vmem [#allocation8], %s1504_s13 }
  0x6a   : > { %1251 = dma.done.wait (%p1395_p8), %s355_s11, 256  }
  0x6b   : > { %1253 = vsyncadd (%p1395_p8), %s355_s11, 4294967040  ;;  %v1296_v0 = vmov 0   ;;  %v1525_v1 = vld [vmem:[%s349_s24] sm:$0xff]  ;;  %v1539_v8 = vld [vmem:[%s349_s24 + $0x8] sm:$0xff]  ;;  %p404_p8 = scmp.lt.s32.totalorder %s1276_s22, 1  ;;  %s1297_s0 = smov 1  }
  0x6c   : > { %1043 = vset.pattern.permute.xlu1 %v1296_v0  ;;  %1042 = vset.pattern.permute.xlu0 %v1296_v0  ;;  %v1527_v2 = vld [vmem:[%s358_s20] sm:$0xff]  ;;  %v462_v4 = vmul.f32 %v1525_v1, %v1525_v1  ;;  %v1541_v9 = vld [vmem:[%s358_s20 + $0x8] sm:$0xff]  ;;  %v463_v11 = vmul.f32 %v1539_v8, %v1539_v8  ;;  %vm429_vm8 = vcmask 130048   ;;  %vm654_vm9 = vcmask 130056   ;;  %s1298_s18 = smov 127   ;;  %s933_s30 = sshll.u32 %s1276_s22, 2 }
  0x6d   : > { %v1529_v3 = vld [vmem:[%s331_s10] sm:$0xff]  ;;  %v464_v5 = vmul.f32 %v1527_v2, %v1527_v2  ;;  %v465_v12 = vmul.f32 %v1541_v9, %v1541_v9  ;;  %v1549_v13 = vld [vmem:[%s331_s10 + $0x8] sm:$0xff]  ;;  %s405_s26 = scalar_select %p404_p8, %s1276_s22, 1 }
  0x6e   : > { %v1535_v6 = vld [vmem:[%s340_s14] sm:$0xff]  ;;  %v442_v7 = vmul.f32 %v1529_v3, %v1529_v3  ;;  %v1551_v14 = vld [vmem:[%s340_s14 + $0x8] sm:$0xff]  ;;  %v443_v18 = vmul.f32 %v1549_v13, %v1549_v13  ;;  %v419_v57 = vsub.f32 %v1529_v3, %v1525_v1  ;;  %v420_v58 = vsub.f32 %v1549_v13, %v1539_v8  ;;  %s733_s17 = sadd.s32 %s1272_s21, %s933_s30  ;;  %s403_s15 = scalar_lea.vmem [#allocation10], %s1501_s12 }
  0x6f   : > { %v444_v10 = vmul.f32 %v1535_v6, %v1535_v6  ;;  %v466_v15 = vadd.f32 %v464_v5, %v462_v4  ;;  %v467_v17 = vadd.f32 %v465_v12, %v463_v11  ;;  %v445_v19 = vmul.f32 %v1551_v14, %v1551_v14  ;;  %s937_s8 = sshll.u32 %s405_s26, 4  ;;  %s934_s28 = sshll.u32 %s733_s17, 4 }
  0x70   : > { %s408_s6 = scalar_lea.vmem %s1673_s4, %s937_s8  ;;  %v423_v59 = vsub.f32 %v1535_v6, %v1527_v2  ;;  %v424_v60 = vsub.f32 %v1551_v14, %v1541_v9  ;;  %v421_v61 = vand.u32 2147483647, %v419_v57  ;;  %v422_v62 = vand.u32 2147483647, %v420_v58  ;;  %s737_s10 = sshll.u32 %s403_s15, 4  ;;  %s738_s10 = int_to_ptr.vmem [resolvable:$true] %s737_s10 }
  0x71   : > { %v446_v16 = vadd.f32 %v444_v10, %v442_v7  ;;  %1044 = vrsqrt.f32 %v466_v15  ;;  %v447_v20 = vadd.f32 %v445_v19, %v443_v18  ;;  %vm470_vm0 = vcmp.eq.f32.partialorder %v466_v15, inf  ;;  %v418_v53 = vld [vmem:[%s408_s6 + $0x8] sm:$0xff]  ;;  %v417_v54 = vld [vmem:[%s408_s6] sm:$0xff]  ;;  %s1622_s21 = scalar_lea.hbm %s1674_s5, %s934_s28  ;;  %s723_s7 = scalar_lea.sflag [#allocation4], %s1501_s12 }
  0x72   : > { %v473_v22 = vand.u32 2147483648, %v466_v15  ;;  %vm472_vm1 = vcmp.eq.f32.partialorder %v466_v15, 0.0  ;;  %vm477_vm4 = vcmp.eq.f32.partialorder %v467_v17, inf  ;;  %v480_v28 = vand.u32 2147483648, %v467_v17  ;;  %s1184_s14 = scalar_lea.vmem %s738_s10, 16  ;;  %s1299_s24 = smov [#allocation10]  }
  0x73   : > { %1046 = vrsqrt.f32 %v446_v16  ;;  %vm450_vm2 = vcmp.eq.f32.partialorder %v446_v16, inf  ;;  %v453_v25 = vand.u32 2147483648, %v446_v16  ;;  %vm452_vm3 = vcmp.eq.f32.partialorder %v446_v16, 0.0  ;;  %p1185_p0 = scmp.ne.s32.totalorder %s738_s10, %s1184_s14  ;;  %s1188_s11 = sshll.u32 %s1299_s24, 4  ;;  %s1189_s11 = int_to_ptr.vmem [resolvable:$false] %s1188_s11 }
  0x74   : > { %1048 = vrsqrt.f32 %v467_v17  ;;  %vm479_vm5 = vcmp.eq.f32.partialorder %v467_v17, 0.0  ;;  %vm457_vm6 = vcmp.eq.f32.partialorder %v447_v20, inf  ;;  %v460_v37 = vand.u32 2147483648, %v447_v20  ;;  %s1190_s20 = scalar_lea.vmem %s1189_s11, 32  ;;  %p1191_p10 = scmp.lt.s32.totalorder %s738_s10, %s1189_s11 }
  0x75   : > { %1050 = vrsqrt.f32 %v447_v20  ;;  %vm459_vm7 = vcmp.eq.f32.partialorder %v447_v20, 0.0  ;;  %v482_v55 = vmul.f32 %v417_v54, %v417_v54  ;;  %v483_v56 = vmul.f32 %v418_v53, %v418_v53  ;;  %p1186_p2 = pnand %p1185_p0, %p1399_p9  ;;  %p1192_p11 = scmp.lt.s32.totalorder %s1190_s20, %s1184_s14 }
  0x76   : > { %v425_v63 = vand.u32 2147483647, %v423_v59  ;;  %v426_v0 = vand.u32 2147483647, %v424_v60 }
  0x77   : > { %p1187_p3 = pneg %p1186_p2  ;;  %p1193_p13 = por %p1192_p11, %p1191_p10 }
  0x78   : > { %v427_v4 = vadd.f32 %v425_v63, %v421_v61  ;;  %v428_v5 = vadd.f32 %v426_v0, %v422_v62 }
  0x79   : > { %p1194_p4 = pnand %p1193_p13, %p1187_p3 }
  0x7a   : > { %v430_v7 = vsel %vm429_vm8, %v427_v4, 0.0  ;;  %v431_v1 = vsel %vm429_vm8, %v428_v5, 0.0 }
  0x7b   : > { %v432_v3 = vadd.f32 %v431_v1, %v430_v7 }
  0x7e   : > { %v1045_v21 = vpop.eup %1044 }
  0x7f   : > { %v469_v24 = vmul.f32 %v1045_v21, %v466_v15 }
  0x80   : > { %v1047_v23 = vpop.eup %1046 }
  0x81   : > { %v1049_v26 = vpop.eup %1048  ;;  %v449_v27 = vmul.f32 %v1047_v23, %v446_v16  ;;  %v471_v29 = vsel %vm470_vm0, %v466_v15, %v469_v24 }
  0x82   : > { %v476_v30 = vmul.f32 %v1049_v26, %v467_v17  ;;  %v1557_v31 = vsel %vm472_vm1, %v473_v22, %v471_v29  ;;  %v1051_v33 = vpop.eup %1050 }
  0x83   : > { %v451_v32 = vsel %vm450_vm2, %v446_v16, %v449_v27  ;;  %v626_v34 = vadd.f32 1e-07, %v1557_v31  ;;  %v456_v40 = vmul.f32 %v1051_v33, %v447_v20  ;;  %v554_v6 = vsel %vm429_vm8, %v1557_v31, 0.0 }
  0x84   : > { %v1560_v35 = vsel %vm452_vm3, %v453_v25, %v451_v32  ;;  %v478_v36 = vsel %vm477_vm4, %v467_v17, %v476_v30  ;;  %vm609_vm2 = vcmask 122880   ;;  %vm699_vm3 = vcmask 114688  }
  0x85   : > { %v620_v38 = vadd.f32 1e-07, %v1560_v35  ;;  %v1563_v39 = vsel %vm479_vm5, %v480_v28, %v478_v36  ;;  %1052 = vlog2.f32 %v626_v34  ;;  %v458_v42 = vsel %vm457_vm6, %v447_v20, %v456_v40 }
  0x86   : > { %v627_v41 = vadd.f32 1e-07, %v1563_v39  ;;  %v1566_v43 = vsel %vm459_vm7, %v460_v37, %v458_v42  ;;  %v484_v8 = vsel %vm429_vm8, %v1560_v35, 0.0  ;;  %v555_v9 = vsel %vm429_vm8, %v1563_v39, 0.0 }
  0x87   : > { %1054 = vlog2.f32 %v620_v38  ;;  %v621_v44 = vadd.f32 1e-07, %v1566_v43  ;;  %v485_v2 = vsel %vm429_vm8, %v1566_v43, 0.0  ;;  %v556_v11 = vadd.f32 %v555_v9, %v554_v6 }
  0x88   : > { %1056 = vlog2.f32 %v627_v41  ;;  %v486_v10 = vadd.f32 %v485_v2, %v484_v8 }
  0x89   : > { %1058 = vlog2.f32 %v621_v44  ;;  %v557_v13 = vrot.slane %v556_v11, 4 }
  0x8a   : > { %v487_v12 = vrot.slane %v486_v10, 4 }
  0x8b   : > { %v558_v15 = vadd.f32 %v557_v13, %v556_v11 }
  0x8c   : > { %v488_v14 = vadd.f32 %v487_v12, %v486_v10 }
  0x8d   : > { %v559_v18 = vrot.slane %v558_v15, 2 }
  0x8e   : > { %v489_v16 = vrot.slane %v488_v14, 2 }
  0x8f   : > { %v560_v27 = vadd.f32 %v559_v18, %v558_v15 }
  0x90   : > { %v490_v23 = vadd.f32 %v489_v16, %v488_v14 }
  0x91   : > { %v561_v37 = vrot.slane %v560_v27, 1 }
  0x92   : > { %v1053_v45 = vpop.eup %1052  ;;  %v491_v33 = vrot.slane %v490_v23, 1 }
  0x93   : > { %v629_v47 = vmul.f32 0.6931472, %v1053_v45 }
  0x94   : > { %v1055_v46 = vpop.eup %1054  ;;  %v1592_v45 = vadd.f32 %v491_v33, %v490_v23 }
  0x95   : > { %v1057_v48 = vpop.eup %1056  ;;  %v623_v49 = vmul.f32 0.6931472, %v1055_v46  ;;  %644 = vrot.lane.b32.xlu1 %v629_v47, %s1297_s0 }
  0x96   : > { %v631_v50 = vmul.f32 0.6931472, %v1057_v48  ;;  %v1059_v51 = vpop.eup %1058 }
  0x97   : > { %634 = vrot.lane.b32.xlu0 %v623_v49, %s1297_s0  ;;  %v625_v52 = vmul.f32 0.6931472, %v1059_v51  ;;  %v535_v51 = vadd.f32 1e-07, %v1592_v45 }
  0x99   : > { %646 = vrot.lane.b32.xlu1 %v631_v50, %s1297_s0  ;;  %1060 = vrcp.f32 %v535_v51 }
  0x9b   : > { %636 = vrot.lane.b32.xlu0 %v625_v52, %s1297_s0 }
  0x9d   : > { %500 = vperm.xlu1 %1043, %v418_v53  }
  0x9f   : > { %495 = vperm.xlu0 %1042, %v417_v54  }
  0xa1   : > { %516 = vperm.xlu1 %1043, %v482_v55  }
  0xa3   : > { %521 = vperm.xlu0 %1042, %v483_v56  }
  0xa6   : > { %v1061_v33 = vpop.eup %1060 }
  0xc2   : > { %433 = vadd.xlane.f32.xlu0 %v432_v3 }
 0x107   : > { %v645_v17 = vpop.permute.xlu1 %644 }
 0x108   : > { %v650_v19 = vsub.f32 %v629_v47, %v645_v17  ;;  %v1594_v47 = vadd.f32 %v561_v37, %v560_v27 }
 0x109   : > { %v635_v20 = vpop.permute.xlu0 %634 }
 0x10a   : > { %v640_v21 = vsub.f32 %v623_v49, %v635_v20  ;;  %v665_v24 = vmul.f32 %v650_v19, %v650_v19  ;;  %v585_v54 = vadd.f32 1e-07, %v1594_v47 }
 0x10b   : > { %v647_v22 = vpop.permute.xlu1 %646 }
 0x10c   : > { %v651_v25 = vsub.f32 %v631_v50, %v647_v22  ;;  %v652_v28 = vmul.f32 %v640_v21, %v640_v21  ;;  %v667_v34 = vsel %vm654_vm9, %v665_v24, 0.0  ;;  %1062 = vrcp.f32 %v585_v54 }
 0x10d   : > { %v637_v26 = vpop.permute.xlu0 %636 }
 0x10e   : > { %v641_v29 = vsub.f32 %v625_v52, %v637_v26  ;;  %v666_v30 = vmul.f32 %v651_v25, %v651_v25  ;;  %v655_v38 = vsel %vm654_vm9, %v652_v28, 0.0 }
 0x110   : > { %v653_v32 = vmul.f32 %v641_v29, %v641_v29  ;;  %v668_v36 = vsel %vm654_vm9, %v666_v30, 0.0 }
 0x111   : > { %v669_v40 = vadd.f32 %v668_v36, %v667_v34 }
 0x112   : > { %v656_v41 = vsel %vm654_vm9, %v653_v32, 0.0 }
 0x113   : > { %v657_v42 = vadd.f32 %v656_v41, %v655_v38  ;;  %v670_v44 = vrot.slane %v669_v40, 4 }
 0x115   : > { %v658_v46 = vrot.slane %v657_v42, 4  ;;  %v671_v48 = vadd.f32 %v670_v44, %v669_v40 }
 0x117   : > { %v659_v49 = vadd.f32 %v658_v46, %v657_v42  ;;  %v672_v50 = vrot.slane %v671_v48, 2 }
 0x118   : > { %v501_v53 = vpop.permute.xlu1 %500 }
 0x119   : > { %v660_v52 = vrot.slane %v659_v49, 2  ;;  %v673_v55 = vadd.f32 %v672_v50, %v671_v48  ;;  %v504_v56 = vmul.f32 %v501_v53, %v1566_v43  ;;  %v564_v57 = vmul.f32 %v501_v53, %v1563_v39  ;;  %v1063_v34 = vpop.eup %1062 }
 0x11a   : > { %v496_v58 = vpop.permute.xlu0 %495 }
 0x11b   : > { %v661_v59 = vadd.f32 %v660_v52, %v659_v49  ;;  %v503_v60 = vmul.f32 %v496_v58, %v1560_v35  ;;  %v563_v61 = vmul.f32 %v496_v58, %v1557_v31  ;;  %v674_v62 = vrot.slane %v673_v55, 1 }
 0x11c   : > { %v506_v63 = vsel %vm429_vm8, %v504_v56, 0.0  ;;  %v566_v0 = vsel %vm429_vm8, %v564_v57, 0.0  ;;  %v517_v1 = vpop.permute.xlu1 %516 }
 0x11d   : > { %v662_v4 = vrot.slane %v661_v59, 1  ;;  %v505_v5 = vsel %vm429_vm8, %v503_v60, 0.0  ;;  %v565_v7 = vsel %vm429_vm8, %v563_v61, 0.0  ;;  %v675_v3 = vadd.f32 %v674_v62, %v673_v55 }
 0x11e   : > { %v507_v8 = vadd.f32 %v506_v63, %v505_v5  ;;  %v567_v2 = vadd.f32 %v566_v0, %v565_v7  ;;  %v524_v6 = vmul.f32 %v517_v1, %v1560_v35  ;;  %v522_v9 = vpop.permute.xlu0 %521  ;;  %v574_v11 = vmul.f32 %v517_v1, %v1557_v31 }
 0x11f   : > { %v663_v10 = vadd.f32 %v662_v4, %v661_v59  ;;  %v525_v12 = vmul.f32 %v522_v9, %v1566_v43  ;;  %v575_v13 = vmul.f32 %v522_v9, %v1563_v39  ;;  %v676_v14 = vmul.f32 18.86117, %v675_v3 }
 0x120   : > { %v508_v15 = vrot.slane %v507_v8, 4  ;;  %v568_v16 = vrot.slane %v567_v2, 4  ;;  %v526_v17 = vsel %vm429_vm8, %v524_v6, 0.0  ;;  %v576_v19 = vsel %vm429_vm8, %v574_v11, 0.0 }
 0x121   : > { %v664_v18 = vmul.f32 18.86117, %v663_v10  ;;  %v527_v20 = vsel %vm429_vm8, %v525_v12, 0.0  ;;  %v577_v35 = vsel %vm429_vm8, %v575_v13, 0.0  ;;  %v685_v21 = vadd.f32 1e-07, %v676_v14 }
 0x122   : > { %v509_v22 = vadd.f32 %v508_v15, %v507_v8  ;;  %v569_v23 = vadd.f32 %v568_v16, %v567_v2  ;;  %v528_v31 = vadd.f32 %v527_v20, %v526_v17  ;;  %v578_v43 = vadd.f32 %v577_v35, %v576_v19 }
 0x123   : > { %v677_v24 = vadd.f32 1e-07, %v664_v18  ;;  %1064 = vrsqrt.f32 %v685_v21  ;;  %vm688_vm10 = vcmp.eq.f32.partialorder %v685_v21, inf  ;;  %vm690_vm11 = vcmp.eq.f32.partialorder %v685_v21, 0.0 }
 0x124   : > { %v510_v39 = vrot.slane %v509_v22, 2  ;;  %v570_v25 = vrot.slane %v569_v23, 2  ;;  %v529_v26 = vrot.slane %v528_v31, 4  ;;  %v579_v27 = vrot.slane %v578_v43, 4 }
 0x125   : > { %1066 = vrsqrt.f32 %v677_v24  ;;  %v691_v0 = vand.u32 2147483648, %v685_v21  ;;  %vm680_vm12 = vcmp.eq.f32.partialorder %v677_v24, inf  ;;  %v683_v7 = vand.u32 2147483648, %v677_v24 }
 0x126   : > { %v511_v28 = vadd.f32 %v510_v39, %v509_v22  ;;  %v571_v29 = vadd.f32 %v570_v25, %v569_v23  ;;  %v530_v30 = vadd.f32 %v529_v26, %v528_v31  ;;  %v580_v32 = vadd.f32 %v579_v27, %v578_v43 }
 0x127   : > { %vm682_vm13 = vcmp.eq.f32.partialorder %v677_v24, 0.0 }
 0x128   : > { %v512_v36 = vrot.slane %v511_v28, 1  ;;  %v572_v37 = vrot.slane %v571_v29, 1  ;;  %v531_v38 = vrot.slane %v530_v30, 2  ;;  %v581_v40 = vrot.slane %v580_v32, 2 }
 0x12a   : > { %v513_v41 = vadd.f32 %v512_v36, %v511_v28  ;;  %v573_v42 = vadd.f32 %v572_v37, %v571_v29  ;;  %v532_v44 = vadd.f32 %v531_v38, %v530_v30  ;;  %v582_v46 = vadd.f32 %v581_v40, %v580_v32 }
 0x12c   : > { %v533_v48 = vrot.slane %v532_v44, 1  ;;  %v583_v49 = vrot.slane %v582_v46, 1  ;;  %v537_v50 = vmul.f32 %v1061_v33, %v513_v41  ;;  %v587_v51 = vmul.f32 %v1063_v34, %v573_v42 }
 0x12e   : > { %v534_v52 = vadd.f32 %v533_v48, %v532_v44  ;;  %v538_v53 = vmul.f32 2.0, %v537_v50  ;;  %v541_v54 = vmul.f32 %v537_v50, %v537_v50  ;;  %v584_v56 = vadd.f32 %v583_v49, %v582_v46 }
 0x12f   : > { %v588_v57 = vmul.f32 2.0, %v587_v51  ;;  %v591_v58 = vmul.f32 %v587_v51, %v587_v51  ;;  %v604_v39 = vsub.f32 %v537_v50, %v587_v51 }
 0x130   : > { %v1065_v55 = vpop.eup %1064  ;;  %v539_v61 = vmul.f32 %v538_v53, %v513_v41  ;;  %v542_v62 = vmul.f32 %v541_v54, %v1592_v45 }
 0x131   : > { %v687_v60 = vmul.f32 %v1065_v55, %v685_v21  ;;  %v589_v4 = vmul.f32 %v588_v57, %v573_v42  ;;  %v592_v5 = vmul.f32 %v591_v58, %v1594_v47  ;;  %v605_v26 = vand.u32 2147483647, %v604_v39 }
 0x132   : > { %v1067_v59 = vpop.eup %1066  ;;  %v540_v3 = vsub.f32 %v534_v52, %v539_v61 }
 0x133   : > { %v679_v63 = vmul.f32 %v1067_v59, %v677_v24  ;;  %v689_v1 = vsel %vm688_vm10, %v685_v21, %v687_v60  ;;  %v590_v6 = vsub.f32 %v584_v56, %v589_v4  ;;  %v710_v59 = vlaneseq }
 0x134   : > { %v692_v2 = vsel %vm690_vm11, %v691_v0, %v689_v1  ;;  %v543_v10 = vadd.f32 %v542_v62, %v540_v3 }
 0x135   : > { %v681_v8 = vsel %vm680_vm12, %v677_v24, %v679_v63  ;;  %v593_v12 = vadd.f32 %v592_v5, %v590_v6  ;;  %v711_v60 = vand.u32 127, %v710_v59 }
 0x136   : > { %v684_v9 = vsel %vm682_vm13, %v683_v7, %v681_v8  ;;  %v544_v13 = vmax.f32 %v543_v10, 0.0 }
 0x137   : > { %v693_v11 = vsub.f32 %v684_v9, %v692_v2  ;;  %v594_v45 = vmax.f32 %v593_v12, 0.0  ;;  %vm714_vm4 = vcmp.eq.s32.totalorder %v711_v60, 2  ;;  %vm713_vm5 = vcmp.eq.s32.totalorder %v711_v60, 1 }
 0x138   : > { %v545_v15 = vmul.f32 %v1061_v33, %v544_v13  ;;  %vm712_vm6 = vcmp.eq.s32.totalorder %v711_v60, 0 }
 0x139   : > { %v694_v14 = vand.u32 2147483647, %v693_v11  ;;  %v595_v16 = vmul.f32 %v1063_v34, %v594_v45 }
 0x13a   : > { %v546_v47 = vadd.f32 1e-07, %v545_v15 }
 0x13b   : > { %696 = vrot.lane.b32.xlu1 %v694_v14, %s1298_s18  ;;  %v596_v17 = vadd.f32 1e-07, %v595_v16 }
 0x13c   : > { %1068 = vrsqrt.f32 %v546_v47  ;;  %vm549_vm14 = vcmp.eq.f32.partialorder %v546_v47, inf  ;;  %v552_v19 = vand.u32 2147483648, %v546_v47  ;;  %vm551_vm15 = vcmp.eq.f32.partialorder %v546_v47, 0.0 }
 0x13d   : > { %1070 = vrsqrt.f32 %v596_v17  ;;  %vm599_vm0 = vcmp.eq.f32.partialorder %v596_v17, inf  ;;  %v602_v21 = vand.u32 2147483648, %v596_v17  ;;  %vm601_vm1 = vcmp.eq.f32.partialorder %v596_v17, 0.0 }
 0x149   : > { %v1069_v18 = vpop.eup %1068 }
 0x14a   : > { %v1071_v20 = vpop.eup %1070  ;;  %v548_v35 = vmul.f32 %v1069_v18, %v546_v47 }
 0x14b   : > { %v598_v22 = vmul.f32 %v1071_v20, %v596_v17  ;;  %v434_v30 = vpop.xlane.xlu0 %433 }
 0x14c   : > { %v550_v23 = vsel %vm549_vm14, %v546_v47, %v548_v35  ;;  %v435_v32 = vrot.slane %v434_v30, 4 }
 0x14d   : > { %v553_v31 = vsel %vm551_vm15, %v552_v19, %v550_v23  ;;  %v600_v24 = vsel %vm599_vm0, %v596_v17, %v598_v22 }
 0x14e   : > { %v603_v43 = vsel %vm601_vm1, %v602_v21, %v600_v24  ;;  %v436_v33 = vadd.f32 %v435_v32, %v434_v30 }
 0x14f   : > { %v606_v25 = vsub.f32 %v553_v31, %v603_v43 }
 0x150   : > { %v437_v34 = vrot.slane %v436_v33, 2 }
 0x151   : > { %v607_v27 = vand.u32 2147483647, %v606_v25 }
 0x152   : > { %v438_v36 = vadd.f32 %v437_v34, %v436_v33 }
 0x153   : > { %v608_v28 = vadd.f32 %v607_v27, %v605_v26 }
 0x154   : > { %v439_v37 = vrot.slane %v438_v36, 1 }
 0x155   : > { %v610_v29 = vsel %vm609_vm2, %v608_v28, 0.0 }
 0x156   : > { %v440_v38 = vadd.f32 %v439_v37, %v438_v36 }
 0x158   : > { %938 = vpush %v440_v38 }
 0x15f   : > { %611 = vadd.xlane.f32.xlu1 %v610_v29 }
 0x189   : > { %s939_s23 = spop %938 }
 0x18a   : > { %v719_v0 = vstv %s939_s23 }
 0x1ad   : > { %v697_v40 = vpop.permute.xlu1 %696 }
 0x1ae   : > { %v700_v41 = vsel %vm699_vm3, %v697_v40, 0.0 }
 0x1af   : > { %701 = vadd.xlane.f32.xlu0 %v700_v41 }
 0x1e8   : > { %v612_v42 = vpop.xlane.xlu1 %611 }
 0x1e9   : > { %v613_v44 = vrot.slane %v612_v42, 4 }
 0x1eb   : > { %v614_v46 = vadd.f32 %v613_v44, %v612_v42 }
 0x1ed   : > { %v615_v48 = vrot.slane %v614_v46, 2 }
 0x1ef   : > { %v616_v49 = vadd.f32 %v615_v48, %v614_v46 }
 0x1f1   : > { %v617_v50 = vrot.slane %v616_v49, 1 }
 0x1f3   : > { %v618_v51 = vadd.f32 %v617_v50, %v616_v49 }
 0x1f5   : > { %940 = vpush %v618_v51 }
 0x226   : > { %s941_s29 = spop %940 }
 0x227   : > { %v717_v62 = vstv %s941_s29 }
 0x238   : > { %v702_v52 = vpop.xlane.xlu0 %701 }
 0x239   : > { %v703_v53 = vrot.slane %v702_v52, 4 }
 0x23b   : > { %v704_v54 = vadd.f32 %v703_v53, %v702_v52 }
 0x23d   : > { %v705_v55 = vrot.slane %v704_v54, 2 }
 0x23f   : > { %v706_v56 = vadd.f32 %v705_v55, %v704_v54 }
 0x241   : > { %v707_v57 = vrot.slane %v706_v56, 1 }
 0x243   : > { %v708_v58 = vadd.f32 %v707_v57, %v706_v56 }
 0x245   : > { %942 = vpush %v708_v58 }
 0x276   : > { %s943_s13 = spop %942 }
 0x277   : > { %v715_v61 = vstv %s943_s13 }
 0x278   : > { %v716_v63 = vsel %vm714_vm4, %v715_v61, 0.0 }
 0x279   : > { %v718_v4 = vsel %vm713_vm5, %v717_v62, %v716_v63 }
 0x27a   : > { %v720_v5 = vsel %vm712_vm6, %v719_v0, %v718_v4 }
 0x27b   : > { %721 = vst [vmem:[%s403_s15] sm:$0x1] %v720_v5 }
 0x27c   : > { %1197 = shalt.err (!%p1194_p4)
}
 0x27d   : > { %s1198_s26 = scalar_lea.hbm %s1622_s21, 16  ;;  %s1202_s0 = scalar_lea.hbm %s1674_s5, 128 }
 0x27e   : > { %p1199_p5 = scmp.ne.s32.totalorder %s1622_s21, %s1198_s26  ;;  %p1203_p7 = scmp.lt.s32.totalorder %s1622_s21, %s1674_s5 }
 0x27f   : > { %p1204_p8 = scmp.lt.s32.totalorder %s1202_s0, %s1198_s26 }
 0x280   : > { %p1200_p6 = pnand %p1199_p5, %p1399_p9 }
 0x281   : > { %p1205_p0 = por %p1204_p8, %p1203_p7 }
 0x282   : > { %p1201_p1 = pneg %p1200_p6 }
 0x284   : > { %p1206_p2 = pnand %p1205_p0, %p1201_p1 }
 0x286   : > { %1209 = shalt.err (!%p1206_p2)
}
 0x287   : > { %952 = dma.vmem_to_hbm [thread:$0]  (%p1399_p9), %s738_s10, 16, %s1622_s21, %s723_s7  }
 0x288 PF: > { %s1703_s6 = sld [smem:[#allocation15_spill]]  ;;  %p972_p3 = scmp.ge.s32.totalorder %s1288_s25, 2 }
 0x28a   : > { %p968_p10 = pnand %p972_p3, %p1405_p12 }
 0x28c   : > { %p969_p11 = pneg %p968_p10 }
 0x28e   : > { %s749_s30 = sand.u32 1, %s1703_s6  }
 0x28f   : > { %s750_s17 = scalar_lea.sflag [#allocation4], %s749_s30 }
 0x290   : > { %1255 = dma.done.wait (%p969_p11), %s750_s17, 16  }
 0x291   : > { %1257 = vsyncadd (%p969_p11), %s750_s17, 4294967280  ;;  %s27_s25 = sadd.s32 1, %s1288_s25   ;;  %s1705_s23 = sld [smem:[#allocation16_spill]] }
 0x292   : > { %p24_p13 = scmp.ge.s32.totalorder %s27_s25, 10   ;;  %s1706_s20 = sld [smem:[#allocation22_spill]] }
 0x293   : > { %s1707_s21 = sld [smem:[#allocation17_spill]]  ;;  %s1711_s18 = smov %s1264_s19 }
 0x294   : > { %s1708_s22 = sld [smem:[#allocation18_spill]] }
 0x295   : > { %s1709_s9 = sld [smem:[#allocation19_spill]] }
 0x296   : > { %s1710_s24 = sld [smem:[#allocation20_spill]] }
 0x297   : > { %s1712_s19 = smov %s1705_s23  ;;  %26 = sbr.rel (!%p24_p13) target bundleno = 14 (0xe), region = 125 }
 0x29b   : > { %s1713_s23 = smov %s1709_s9 }
 0x29c   :  { %754 = vsyncpa [#allocation3], 1 }
 0x29d   :  { %756 = vsyncpa [#allocation3 + $0x1], 1 }
 0x29e   :  { %757 = vsyncpa [#allocation6], 1 }
 0x29f   :  { %759 = vsyncpa [#allocation6 + $0x1], 1 }
 0x2a0   :  { %760 = vsyncpa [#allocation9], 1 }
 0x2a1   :  { %762 = vsyncpa [#allocation9 + $0x1], 1 }
 0x2a2   :  { %763 = vsyncpa [#allocation4], 1 }
 0x2a3   :  { %765 = vsyncpa [#allocation4 + $0x1], 1 }

</bundles_post_ra>
